<compile_context>
chip_gen: v7x
topology: tpu7x:2x2x1
jax: 0.10.0
libtpu: 0.0.40
codegen_flags: <defaults>
</compile_context>

<pallas_src>
import functools
import math

import jax
import jax.numpy as jnp
from jax.experimental import pallas as pl
from jax.experimental.pallas import tpu as pltpu


_PE_RESIDENT_MAX_BYTES = 2 * 1024 * 1024  # keep the whole PE table VMEM-resident below this


def _pe_concat_kernel(x_ref, pe_ref, o_ref, *, d_in: int, dim: int, k: int,
                      split_store: bool, pe_slice: bool, seq_tile_p: int):
    """Concatenate the x tile and the PE rows for this tile into the output tile."""
    x = x_ref[...]

    if pe_slice:
        # Full PE table is resident in VMEM (DMA'd once); select this tile's rows.
        start = pl.program_id(0) * seq_tile_p
        if seq_tile_p % 8 == 0:
            start = pl.multiple_of(start, 8)
        pe = pe_ref[pl.ds(start, seq_tile_p), :]
    else:
        pe = pe_ref[...]

    if k > 1:
        # Packed path: each output row holds k logical rows -> build the 128*m-lane
        # row with a lane concatenate and do one unmasked full-width store.
        pieces = []
        for j in range(k):
            pieces.append(x[:, j * d_in:(j + 1) * d_in])
            pieces.append(pe[:, j * dim:(j + 1) * dim])
        o_ref[...] = jnp.concatenate(pieces, axis=-1)
    elif split_store:
        # D_in and dimension both 128-aligned: two lane-tile-aligned direct stores,
        # no concatenated temp.
        o_ref[:, :d_in] = x
        o_ref[:, d_in:] = pe
    else:
        # Fallback (D_out not packable to a 128 multiple): single concatenated store.
        o_ref[...] = jnp.concatenate([x, pe], axis=-1)


def _make_pe_table(num_rows: int, dimension: int, dtype) -> jax.Array:
    """Sinusoidal PE table, computed once in plain JAX (matches the torch forward)."""
    position = jnp.arange(num_rows, dtype=jnp.float32)[:, None]
    div_term = jnp.exp(
        jnp.arange(0, dimension, 2, dtype=jnp.float32)
        * (-math.log(10000.0) / dimension)
    )
    angles = position * div_term                      # (num_rows, dimension // 2)
    pe = jnp.zeros((num_rows, dimension), jnp.float32)
    pe = pe.at[:, 0::2].set(jnp.sin(angles))
    pe = pe.at[:, 1::2].set(jnp.cos(angles))
    return pe.astype(dtype)


def _pack_factor(S: int, d_in: int, dimension: int) -> int:
    """Smallest row-packing factor k making k*D_out a multiple of 128 (lane-dense
    output); escalates k while it also makes the inputs lane-dense."""
    d_out = d_in + dimension
    best = None
    for k in (1, 2, 4, 8):
        if S % k or (k * d_out) % 128:
            continue
        if best is None:
            best = k
        if (k * d_in) % 128 == 0 and (k * dimension) % 128 == 0:
            return k                                   # fully lane-dense (inputs + output)
    return best if best is not None else 1


def _sublane_multiple(itemsize: int) -> int:
    """Dtype-aware sublane rounding: 8 rows f32, 16 bf16/f16, 32 int8/fp8."""
    return 8 * max(1, 4 // max(1, itemsize))


def _vmem_plan():
    """Generation-aware (v5e/v6e: 128 MiB VMEM, v7x: 64 MiB) tile budget + VMEM limit."""
    try:
        cap = int(pltpu.get_tpu_info().vmem_capacity_bytes)
    except Exception:
        cap = 64 << 20                                  # conservative (v7x-sized) fallback
    tile_budget = max(8 << 20, (cap * 3) // 8)          # 48 MiB v5e/v6e, 24 MiB v7x
    vmem_limit = max(24 << 20, min(cap - (16 << 20), tile_budget + (16 << 20)))
    return tile_budget, vmem_limit                      # (48, 64) MiB v5e/v6e, (24, 40) v7x


def positional_encoding(x: jax.Array, dimension: int, *, seq_tile: int | None = None) -> jax.Array:
    """Pallas implementation of PositionalEncoding.forward (eval mode).

    `seq_tile` (in original sequence rows) is an optional override used by tests to
    force multi-tile / ragged-edge execution at small shapes.
    """
    assert dimension % 2 == 0, "dimension must be even (torch 0::2 / 1::2 slicing)"
    B, S, D_in = x.shape
    D_out = D_in + dimension
    dtype = x.dtype
    itemsize = jnp.dtype(dtype).itemsize

    # --- row packing for lane-dense stores/DMAs -------------------------------------
    k = _pack_factor(S, D_in, dimension)
    S_p = S // k
    d_in_k, dim_k, d_out_k = k * D_in, k * dimension, k * D_out

    # --- generation-aware tile sizing (by bytes, no row cap) ------------------------
    sublane = _sublane_multiple(itemsize)
    tile_budget, vmem_limit = _vmem_plan()

    pe_bytes = S_p * dim_k * itemsize
    pe_resident = pe_bytes <= _PE_RESIDENT_MAX_BYTES

    # Bytes per packed row held in double-buffered tiles each grid step.
    row_bytes = 2 * (d_in_k + d_out_k) * itemsize
    if not pe_resident:
        row_bytes += 2 * dim_k * itemsize
    budget = tile_budget - (2 * pe_bytes if pe_resident else 0)
    budget = max(budget, tile_budget // 2)

    if seq_tile is not None:
        ts_p = max(1, min(S_p, seq_tile // k))
    else:
        ts_p = min(S_p, max(sublane, budget // max(1, row_bytes)))
    if ts_p < S_p:
        ts_p = max(sublane, (ts_p // sublane) * sublane)   # keep block sublane dim aligned
    ts_p = min(ts_p, S_p)

    num_s_tiles = pl.cdiv(S_p, ts_p)
    pe_slice = pe_resident and num_s_tiles > 1

    # PE table: padded to whole tiles when resident so the in-kernel dynamic row slice
    # is always in bounds (extra rows are valid sin/cos values, never written out).
    pe_rows_p = num_s_tiles * ts_p if pe_resident else S_p
    pe = _make_pe_table(pe_rows_p * k, dimension, dtype).reshape(pe_rows_p, dim_k)

    x_k = x.reshape(B, S_p, d_in_k)                        # free (contiguous) reshape

    split_store = (k == 1 and D_in % 128 == 0 and dimension % 128 == 0)

    kernel = functools.partial(
        _pe_concat_kernel, d_in=D_in, dim=dimension, k=k,
        split_store=split_store, pe_slice=pe_slice, seq_tile_p=ts_p)

    if pe_resident:
        # Constant block index -> the whole PE table is DMA'd into VMEM exactly once.
        pe_spec = pl.BlockSpec((pe_rows_p, dim_k), lambda s, b: (0, 0))
    else:
        # Per-s-tile PE block; constant over the inner batch axis so it stays resident
        # across B and is only re-DMA'd when the sequence tile changes.
        pe_spec = pl.BlockSpec((ts_p, dim_k), lambda s, b: (s, 0))

    cost = pl.CostEstimate(
        flops=0,
        transcendentals=0,
        bytes_accessed=(B * S * D_in + pe_rows_p * dim_k + B * S * D_out) * itemsize,
    )

    out_k = pl.pallas_call(
        kernel,
        out_shape=jax.ShapeDtypeStruct((B, S_p, d_out_k), dtype),
        grid=(num_s_tiles, B),
        in_specs=[
            pl.BlockSpec((pl.Squeezed(), ts_p, d_in_k), lambda s, b: (b, s, 0)),
            pe_spec,
        ],
        out_specs=pl.BlockSpec((pl.Squeezed(), ts_p, d_out_k), lambda s, b: (b, s, 0)),
        compiler_params=pltpu.CompilerParams(
            dimension_semantics=("parallel", "parallel"),   # v7x megacore can split both
            vmem_limit_bytes=int(vmem_limit),
        ),
        cost_estimate=cost,
    )(x_k, pe)

    # Undo the row packing (pure metadata reshape of a contiguous array).
    return out_k.reshape(B, S, D_out)


def _reference(x: jax.Array, dimension: int) -> jax.Array:
    """Pure-JAX reference mirroring the PyTorch forward (dropout in eval mode)."""
    B, S, _ = x.shape
    pe = _make_pe_table(S, dimension, x.dtype)
    pe = jnp.broadcast_to(pe[None], (B, S, dimension))
    return jnp.concatenate([x, pe], axis=-1)


def _run_case(name, key, B, S, D_in, dim, dtype, seq_tile=None, atol=1e-5):
    x = jax.random.normal(key, (B, S, D_in), dtype=jnp.float32).astype(dtype)
    out = jax.block_until_ready(positional_encoding(x, dim, seq_tile=seq_tile))
    ref = _reference(x, dim)
    assert out.shape == (B, S, D_in + dim), (name, out.shape)
    ok = jnp.allclose(out.astype(jnp.float32), ref.astype(jnp.float32),
                      atol=atol, rtol=atol)
    assert bool(ok), f"mismatch vs reference in case {name}"


if __name__ == "__main__":
    key = jax.random.PRNGKey(0)
    k0, k1, k2, k3 = jax.random.split(key, 4)

    # 1) Module-default small shape: packed path (k=4, lane-dense 256-wide rows).
    _run_case("packed_small", k0, B=2, S=8, D_in=32, dim=32, dtype=jnp.float32)
    # 2) 128-aligned feature widths: k=1 split-store path (two aligned direct stores).
    _run_case("aligned_split", k1, B=2, S=16, D_in=128, dim=128, dtype=jnp.float32)
    # 3) bf16, forced multi-tile with a ragged last sequence tile, resident-PE slicing.
    _run_case("bf16_ragged_multitile", k2, B=2, S=96, D_in=32, dim=32,
              dtype=jnp.bfloat16, seq_tile=64, atol=2e-2)
    # 4) Unpackable odd sequence length: masked-concat fallback path.
    _run_case("fallback_masked", k3, B=2, S=7, D_in=20, dim=12, dtype=jnp.float32)

    print("KERNEL_OK")
</pallas_src>

<mosaic_0001>
module attributes {stable_mosaic.version = 11 : i64} {
  func.func @_pe_concat_kernel(%arg0: i32, %arg1: i32, %arg2: memref<1x2x128xf32, #tpu.memory_space<vmem>>, %arg3: memref<2x128xf32, #tpu.memory_space<vmem>>, %arg4: memref<1x2x256xf32, #tpu.memory_space<vmem>>) attributes {dimension_semantics = [#tpu.dimension_semantics<parallel>, #tpu.dimension_semantics<parallel>], iteration_bounds = array<i64: 1, 2>, scalar_prefetch = 0 : i64, scratch_operands = 0 : i64, tpu.core_type = #tpu.core_type<tc>, window_params = [{transform_indices = @transform_0, window_bounds = array<i64: 1, 2, 128>}, {pipeline_mode = #tpu.pipeline_mode<synchronous>, transform_indices = @transform_1, window_bounds = array<i64: 2, 128>}, {transform_indices = @transform_2, window_bounds = array<i64: 1, 2, 256>}]} {
    %c0 = arith.constant 0 : index
    %c0_0 = arith.constant 0 : index
    %c0_1 = arith.constant 0 : index
    %0 = vector.load %arg2[%c0, %c0_0, %c0_1] : memref<1x2x128xf32, #tpu.memory_space<vmem>>, vector<1x2x128xf32>
    %1 = vector.shape_cast %0 : vector<1x2x128xf32> to vector<2x128xf32>
    %c0_2 = arith.constant 0 : index
    %c0_3 = arith.constant 0 : index
    %2 = vector.load %arg3[%c0_2, %c0_3] : memref<2x128xf32, #tpu.memory_space<vmem>>, vector<2x128xf32>
    %3 = vector.extract_strided_slice %1 {offsets = [0, 0], sizes = [2, 32], strides = [1, 1]} : vector<2x128xf32> to vector<2x32xf32>
    %4 = vector.extract_strided_slice %2 {offsets = [0, 0], sizes = [2, 32], strides = [1, 1]} : vector<2x128xf32> to vector<2x32xf32>
    %5 = vector.extract_strided_slice %1 {offsets = [0, 32], sizes = [2, 32], strides = [1, 1]} : vector<2x128xf32> to vector<2x32xf32>
    %6 = vector.extract_strided_slice %2 {offsets = [0, 32], sizes = [2, 32], strides = [1, 1]} : vector<2x128xf32> to vector<2x32xf32>
    %7 = vector.extract_strided_slice %1 {offsets = [0, 64], sizes = [2, 32], strides = [1, 1]} : vector<2x128xf32> to vector<2x32xf32>
    %8 = vector.extract_strided_slice %2 {offsets = [0, 64], sizes = [2, 32], strides = [1, 1]} : vector<2x128xf32> to vector<2x32xf32>
    %9 = vector.extract_strided_slice %1 {offsets = [0, 96], sizes = [2, 32], strides = [1, 1]} : vector<2x128xf32> to vector<2x32xf32>
    %10 = vector.extract_strided_slice %2 {offsets = [0, 96], sizes = [2, 32], strides = [1, 1]} : vector<2x128xf32> to vector<2x32xf32>
    %11 = tpu.concatenate %3, %4, %5, %6, %7, %8, %9, %10 in 1 : vector<2x32xf32>, vector<2x32xf32>, vector<2x32xf32>, vector<2x32xf32>, vector<2x32xf32>, vector<2x32xf32>, vector<2x32xf32>, vector<2x32xf32> -> vector<2x256xf32>
    %c0_4 = arith.constant 0 : index
    %c0_5 = arith.constant 0 : index
    %c0_6 = arith.constant 0 : index
    %12 = vector.load %arg4[%c0_4, %c0_5, %c0_6] : memref<1x2x256xf32, #tpu.memory_space<vmem>>, vector<1x2x256xf32>
    %13 = vector.shape_cast %12 : vector<1x2x256xf32> to vector<2x256xf32>
    %14 = vector.shape_cast %11 : vector<2x256xf32> to vector<1x2x256xf32>
    tpu.vector_store %arg4[%c0_4, %c0_5, %c0_6], %14 {strides = array<i32>} : memref<1x2x256xf32, #tpu.memory_space<vmem>>, vector<1x2x256xf32>,
    return
  }
  func.func @transform_0(%arg0: i32, %arg1: i32) -> (i32, i32, i32) {
    %c0_i32 = arith.constant 0 : i32
    %c0_i32_0 = arith.constant 0 : i32
    return %arg1, %arg0, %c0_i32 : i32, i32, i32
  }
  func.func @transform_1(%arg0: i32, %arg1: i32) -> (i32, i32) {
    %c0_i32 = arith.constant 0 : i32
    %c0_i32_0 = arith.constant 0 : i32
    %c0_i32_1 = arith.constant 0 : i32
    return %c0_i32, %c0_i32_0 : i32, i32
  }
  func.func @transform_2(%arg0: i32, %arg1: i32) -> (i32, i32, i32) {
    %c0_i32 = arith.constant 0 : i32
    %c0_i32_0 = arith.constant 0 : i32
    return %arg1, %arg0, %c0_i32 : i32, i32, i32
  }
}

</mosaic_0001>

<bundles_post_ra>
// kernel: tpu_custom_call.1
= control target key start
LH: loop header
LB: loop body
LE: loop exit
PB: predicated region body
PF: predicated region fallthrough
CT: control target
= control target key end

     0   :  { %7 = vsyncpa [#allocation3], 0  ;;  %s709_s0 = inlined_call_operand.hbm [shape: f32[2,2,128], index: 0, kind: input, shape index: {}]   ;;  %s710_s1 = inlined_call_operand.vmem [shape: f32[2,128], index: 1, kind: input, shape index: {}]   ;;  %s711_s2 = inlined_call_operand.hbm [shape: f32[2,2,256], index: 2, kind: output, shape index: {}]  }
   0x1   :  { %9 = vsyncpa [#allocation3 + $0x1], 0 }
   0x2   :  { %10 = vsyncpa [#allocation4], 0 }
   0x3   :  { %12 = vsyncpa [#allocation4 + $0x1], 0  ;;  %s533_s9 = smov 0   ;;  %s535_s10 = smov 0  }
   0x4   :  { %s537_s11 = smov 0   ;;  %s539_s12 = smov 0  }
   0x5   :  { %s541_s13 = smov 0   ;;  %s543_s14 = smov 0  }
   0x6 LB: > { %s318_s15 = sadd.s32 4294967295, %s511_s14   ;;  %s319_s16 = sadd.s32 4294967294, %s511_s14   ;;  %s511_s14 = sphi %s543_s14, %s18_s14   ;;  %s507_s13 = sphi %s541_s13, %s727_s13   ;;  %s503_s12 = sphi %s539_s12, %s726_s12   ;;  %s499_s11 = sphi %s537_s11, %s725_s11   ;;  %s495_s10 = sphi %s535_s10, %s724_s10   ;;  %s491_s9 = sphi %s533_s9, %s723_s9  }
   0x7   : > { %s27_s17 = sadd.s32 1, %s507_s13  ;;  %s39_s18 = sadd.s32 1, %s499_s11 }
   0x8   : > { %p28_p0 = scmp.ge.s32.totalorder %s27_s17, 2  ;;  %p46_p1 = scmp.ne.s32.totalorder %s499_s11, %s495_s10 }
   0x9   : > { %p47_p2 = scmp.eq.s32.totalorder %s511_s14, 0  ;;  %p52_p3 = scmp.ne.s32.totalorder %s495_s10, %s491_s9 }
   0xa   : > { %s729_s17 = smov (%p28_p0, %s27_s17), 0  ;;  %p53_p5 = scmp.eq.s32.totalorder %s318_s15, 0 }
   0xb   : > { %p574_p4 = por %p47_p2, %p46_p1  ;;  %s34_s20 = ssub.s32 %s507_s13, %s729_s17 }
   0xc   : > { %p99_p6 = scmp.eq.s32.totalorder %s318_s15, 1  ;;  %p37_p7 = scmp.eq.s32.totalorder %s34_s20, 0 }
   0xd   : > { %p580_p8 = por %p53_p5, %p52_p3  ;;  %p105_p10 = scmp.eq.s32.totalorder %s319_s16, 1 }
   0xe   : > { %p584_p9 = por %p99_p6, %p46_p1  ;;  %p346_p13 = scmp.lt.s32.totalorder %s511_s14, 2 }
   0xf   : > { %s589_s23 = scalar_select %p37_p7, %s499_s11, %s39_s18  }
  0x10   : > { %s715_s22 = scalar_select %p584_p9, 1, 0 }
  0x11   : > { %p591_p11 = por %p105_p10, %p52_p3  ;;  %s128_s25 = sand.u32 1, %s499_s11  }
  0x12   : > { %s322_s26 = sshll.u32 %s128_s25, 1  ;;  %s323_s27 = sshll.u32 %s507_s13, 5 }
  0x13   : > { %s716_s24 = scalar_select %p591_p11, 1, 0 }
  0x14   : > { %s602_s30 = scalar_lea.hbm %s709_s0, %s323_s27  ;;  %s132_s3 = scalar_lea.vmem [#allocation2], %s322_s26 }
  0x15   : > { %s140_s4 = sshll.u32 %s132_s3, 4  ;;  %p608_p0 = pnand %p346_p13, %p574_p4  ;;  %s604_s4 = int_to_ptr.vmem [resolvable:$true] %s140_s4 }
  0x16   : > { %s129_s6 = scalar_lea.sflag [#allocation3], %s128_s25  ;;  %s399_s7 = scalar_lea.hbm %s602_s30, 32 }
  0x17   : > { %p400_p3 = scmp.ne.s32.totalorder %s602_s30, %s399_s7  ;;  %p401_p5 = pneg %p608_p0 }
  0x18   : > { %s404_s16 = scalar_lea.hbm %s709_s0, 64  ;;  %p405_p4 = scmp.lt.u32.totalorder %s602_s30, %s709_s0 }
  0x19   : > { %p402_p6 = pnand %p401_p5, %p400_p3  ;;  %p406_p10 = scmp.lt.u32.totalorder %s404_s16, %s399_s7 }
  0x1a   : > { %p408_p12 = scmp.lt.u32.totalorder %s399_s7, %s602_s30 }
  0x1b   : > { %p403_p7 = pneg %p402_p6  ;;  %p407_p13 = por %p406_p10, %p405_p4 }
  0x1d   : > { %p409_p1 = por %p408_p12, %p407_p13 }
  0x1f   : > { %p410_p2 = pnand %p409_p1, %p403_p7 }
  0x21   : > { %413 = shalt.err (!%p410_p2)
}
  0x22   : > { %s414_s20 = scalar_lea.vmem %s604_s4, 32  ;;  %s513_s25 = smov [#allocation2]  }
  0x23   : > { %p415_p3 = scmp.ne.s32.totalorder %s604_s4, %s414_s20  ;;  %s419_s26 = sshll.u32 %s513_s25, 4  ;;  %s420_s26 = int_to_ptr.vmem [resolvable:$false] %s419_s26 }
  0x24   : > { %s421_s27 = scalar_lea.vmem %s420_s26, 64  ;;  %p422_p9 = scmp.lt.s32.totalorder %s604_s4, %s420_s26 }
  0x25   : > { %p417_p6 = pnand %p415_p3, %p401_p5  ;;  %p423_p4 = scmp.lt.s32.totalorder %s421_s27, %s414_s20 }
  0x27   : > { %p418_p11 = pneg %p417_p6  ;;  %p424_p10 = por %p423_p4, %p422_p9 }
  0x29   : > { %p425_p12 = pnand %p424_p10, %p418_p11 }
  0x2b   : > { %428 = shalt.err (!%p425_p12)
}
  0x2c   : > { %341 = dma.hbm_to_vmem [thread:$0]  (!%p608_p0), %s602_s30, 32, %s604_s4, %s129_s6  }
  0x2d   : > { %p718_p1 = scmp.lt.s32.totalorder %s511_s14, 3  ;;  %p719_p2 = scmp.ge.s32.totalorder %s511_s14, 1 }
  0x2f   : > { %p146_p5 = pnand %p719_p2, %p718_p1 }
  0x30   : > { %s644_s28 = sand.u32 (!%p146_p5), 1, %s495_s10  }
  0x31   : > { %149 = sbr.rel (%p146_p5) target bundleno = 199 (0xc7), region = 28  ;;  %s325_s29 = sshll.u32 (!%p146_p5), %s644_s28, 1 }
  0x32   : > { %s152_s3 = scalar_lea.sflag (!%p146_p5), [#allocation3], %s644_s28  ;;  %s155_s7 = scalar_lea.vmem (!%p146_p5), [#allocation2], %s325_s29 }
  0x38   : > { %482 = dma.done.wait (%p580_p8), %s152_s3, 32  }
  0x39   : > { %484 = vsyncadd (%p580_p8), %s152_s3, 4294967264  ;;  %v177_v0 = vld [vmem:[%s710_s1] sm:$0x3]  ;;  %s514_s4 = smov 96   ;;  %s515_s6 = smov 32   ;;  %vm198_vm0 = vcmask 261120  }
  0x3a   : > { %192 = vrot.lane.b32.xlu1 %v177_v0, %s514_s4  ;;  %179 = vrot.lane.b32.xlu0 %v177_v0, %s515_s6  ;;  %v176_v1 = vld [vmem:[%s155_s7] sm:$0x3]  ;;  %s516_s8 = smov 64   ;;  %s326_s21 = sshll.u32 %s644_s28, 2  ;;  %vm200_vm1 = vcmask 523264   ;;  %vm202_vm2 = vcmask 785408  }
  0x3b   : > { %s333_s15 = sshll.u32 %s503_s12, 6  ;;  %s175_s16 = scalar_lea.vmem [#allocation5], %s326_s21 }
  0x3c   : > { %s236_s18 = sshll.u32 %s175_s16, 4  ;;  %s660_s25 = scalar_lea.hbm %s711_s2, %s333_s15  ;;  %s662_s18 = int_to_ptr.vmem [resolvable:$true] %s236_s18 }
  0x3d   : > { %s220_s26 = scalar_lea.sflag [#allocation4], %s644_s28  ;;  %s429_s27 = scalar_lea.vmem %s662_s18, 64 }
  0x3e   : > { %183 = vrot.lane.b32.xlu1 %v176_v1, %s515_s6  ;;  %189 = vrot.lane.b32.xlu0 %v176_v1, %s516_s8  ;;  %p430_p8 = scmp.ne.s32.totalorder %s662_s18, %s429_s27  ;;  %p720_p9 = scmp.ne.s32.totalorder %s715_s22, 0 }
  0x3f   : > { %s517_s12 = smov [#allocation5]  }
  0x40   : > { %p431_p11 = pnand %p430_p8, %p720_p9  ;;  %s433_s29 = sshll.u32 %s517_s12, 4  ;;  %s434_s29 = int_to_ptr.vmem [resolvable:$false] %s433_s29 }
  0x41   : > { %s435_s3 = scalar_lea.vmem %s434_s29, 128  ;;  %p436_p7 = scmp.lt.s32.totalorder %s662_s18, %s434_s29 }
  0x42   : > { %186 = vrot.lane.b32.xlu1 %v177_v0, %s516_s8  ;;  %195 = vrot.lane.b32.xlu0 %v176_v1, %s514_s4  ;;  %p432_p0 = pneg %p431_p11  ;;  %p437_p13 = scmp.lt.s32.totalorder %s435_s3, %s429_s27 }
  0x44   : > { %p438_p3 = por %p437_p13, %p436_p7 }
  0x46   : > { %p439_p6 = pnand %p438_p3, %p432_p0 }
  0xac   : > { %v193_v2 = vpop.permute.xlu1 %192  ;;  %v180_v3 = vpop.permute.xlu0 %179 }
  0xad   : > { %v199_v6 = vsel %vm198_vm0, %v176_v1, %v180_v3 }
  0xb0   : > { %v184_v4 = vpop.permute.xlu1 %183  ;;  %v190_v5 = vpop.permute.xlu0 %189 }
  0xb1   : > { %v201_v7 = vsel %vm200_vm1, %v199_v6, %v184_v4  ;;  %v204_v8 = vsel %vm198_vm0, %v190_v5, %v193_v2 }
  0xb4   : > { %v187_v9 = vpop.permute.xlu1 %186  ;;  %v196_v10 = vpop.permute.xlu0 %195 }
  0xb5   : > { %v203_v11 = vsel %vm202_vm2, %v201_v7, %v187_v9  ;;  %v205_v12 = vsel %vm200_vm1, %v204_v8, %v196_v10 }
  0xb6   : > { %v206_v13 = vsel %vm202_vm2, %v205_v12, %v177_v0 }
  0xb7   : > { %v209_v14 = vcombine.low %v203_v11, %v206_v13 }
  0xb9   : > { %327 = vst.sshfl [vmem:[%s175_s16] sm:$0x33 pattern:$0x76325410] %v209_v14 }
  0xba   : > { %442 = shalt.err (!%p439_p6)
}
  0xbb   : > { %s443_s28 = scalar_lea.hbm %s660_s25, 64  ;;  %s447_s30 = scalar_lea.hbm %s711_s2, 128 }
  0xbc   : > { %p444_p4 = scmp.ne.s32.totalorder %s660_s25, %s443_s28  ;;  %p448_p1 = scmp.lt.u32.totalorder %s660_s25, %s711_s2 }
  0xbd   : > { %p449_p2 = scmp.lt.u32.totalorder %s447_s30, %s443_s28  ;;  %p451_p8 = scmp.lt.u32.totalorder %s443_s28, %s660_s25 }
  0xbe   : > { %p445_p10 = pnand %p444_p4, %p720_p9 }
  0xbf   : > { %p450_p5 = por %p449_p2, %p448_p1 }
  0xc0   : > { %p446_p12 = pneg %p445_p10 }
  0xc1   : > { %p452_p11 = por %p451_p8, %p450_p5 }
  0xc3   : > { %p453_p0 = pnand %p452_p11, %p446_p12 }
  0xc5   : > { %456 = shalt.err (!%p453_p0)
}
  0xc6   : > { %336 = dma.vmem_to_hbm [thread:$0]  (%p720_p9), %s662_s18, 64, %s660_s25, %s220_s26  }
  0xc7 PF: > { %s248_s8 = sand.u32 1, %s491_s9   ;;  %p721_p7 = scmp.ne.s32.totalorder %s716_s24, 0 }
  0xc8   : > { %p722_p13 = scmp.ge.s32.totalorder %s511_s14, 2  ;;  %s249_s21 = scalar_lea.sflag [#allocation4], %s248_s8 }
  0xca   : > { %p343_p3 = pnand %p722_p13, %p721_p7 }
  0xcc   : > { %486 = dma.done.wait (!%p343_p3), %s249_s21, 64  }
  0xcd   : > { %488 = vsyncadd (!%p343_p3), %s249_s21, 4294967232  ;;  %s18_s14 = sadd.s32 1, %s511_s14   ;;  %s723_s9 = smov %s495_s10 }
  0xce   : > { %p15_p6 = scmp.ge.s32.totalorder %s18_s14, 4   ;;  %s724_s10 = smov %s499_s11 }
  0xcf   : > { %s725_s11 = smov %s589_s23  ;;  %s726_s12 = smov %s507_s13 }
  0xd0   : > { %s727_s13 = smov %s729_s17  ;;  %17 = sbr.rel (!%p15_p6) target bundleno = 6 (0x6), region = 73 }
  0xd7   :  { %254 = vsyncpa [#allocation3], 1 }
  0xd8   :  { %256 = vsyncpa [#allocation3 + $0x1], 1 }
  0xd9   :  { %257 = vsyncpa [#allocation4], 1 }
  0xda   :  { %259 = vsyncpa [#allocation4 + $0x1], 1 }

</bundles_post_ra>
